<compile_context>
chip_gen: v6e
topology: v6e:2x2x1
jax: 0.10.0
libtpu: 0.0.40
codegen_flags: <defaults>
</compile_context>

<pallas_src>
import functools

import jax
import jax.numpy as jnp
from jax.experimental import pallas as pl
from jax.experimental.pallas import tpu as pltpu


# --------------------------------------------------------------------------
# Fused Pallas kernel
# --------------------------------------------------------------------------
def _vae_m2_kernel(n_enc_hidden, n_dec_hidden, output_activation, act_dtype,
                   *refs):
    """refs = inputs + outputs.

    inputs : xy, y, eps,
             W_enc0, b_enc0, (W_h, b_h) * (n_enc_hidden - 1),
             W_mu, b_mu, W_lv, b_lv,
             W_dec0_z, W_dec0_y, b_dec0, (W_h, b_h) * (n_dec_hidden - 1),
             W_out, b_out
    outputs: mu_ref [TB, L8], logvar_ref [TB, L8], out_ref [TB, Dout8]
    """
    mu_ref, logvar_ref, out_ref = refs[-3], refs[-2], refs[-1]
    it = iter(refs[:-3])

    xy = next(it)[...]          # [TB, K0e]  f32  (concat(x, y), fused K pass)
    y = next(it)[...]           # [TB, C8]   f32
    eps = next(it)[...]         # [TB, L8]   f32

    def mxu(a, w_ref):
        # Cast activation to the weight dtype at the MXU input only; always
        # accumulate in f32.
        w = w_ref[...]
        return jnp.dot(a.astype(w.dtype), w, preferred_element_type=jnp.float32)

    def dense_relu(a, w_ref, b):
        # f32 bias-add + ReLU, then keep h in act_dtype (bf16 on v6e/v7x)
        # so the next layer needs no re-cast and h's VMEM footprint halves.
        return jnp.maximum(mxu(a, w_ref) + b, 0.0).astype(act_dtype)

    # ---- Encoder ----
    w, b = next(it), next(it)[...]
    h = dense_relu(xy, w, b)
    for _ in range(n_enc_hidden - 1):
        w, b = next(it), next(it)[...]
        h = dense_relu(h, w, b)

    w_mu, b_mu = next(it), next(it)[...]
    w_lv, b_lv = next(it), next(it)[...]
    mu = mxu(h, w_mu) + b_mu                # f32
    logvar = mxu(h, w_lv) + b_lv            # f32
    # Store mu/logvar now (not in the epilogue): frees their live footprint
    # during the decoder and lets the output-tile DMA overlap decoder compute.
    # z is NOT written to HBM (the module does not return it).
    mu_ref[...] = mu
    logvar_ref[...] = logvar
    z = mu + jnp.exp(0.5 * logvar) * eps    # reparameterization trick (f32)

    # ---- Decoder ----
    # First layer = concat(z, y) @ W, expressed as two small-K matmuls because
    # z only exists inside the kernel (K is tiny and unpadded, so the extra
    # result-pop is negligible).
    w_dz, w_dy, b0 = next(it), next(it), next(it)[...]
    h = jnp.maximum(mxu(z, w_dz) + mxu(y, w_dy) + b0, 0.0).astype(act_dtype)
    for _ in range(n_dec_hidden - 1):
        w, b = next(it), next(it)[...]
        h = dense_relu(h, w, b)

    w_out, b_out = next(it), next(it)[...]
    out = mxu(h, w_out) + b_out
    if output_activation == "sigmoid":
        out = jax.nn.sigmoid(out)
    elif output_activation == "tanh":
        out = jnp.tanh(out)
    # TODO(synk): other torch output-activation modules (e.g. Softplus) not wired up.
    out_ref[...] = out


# --------------------------------------------------------------------------
# Parameter init (PyTorch nn.Linear-style uniform init, deterministic)
# --------------------------------------------------------------------------
def _init_linear(key, fan_in, fan_out):
    kw, kb = jax.random.split(key)
    bound = 1.0 / jnp.sqrt(jnp.asarray(fan_in, jnp.float32))
    w = jax.random.uniform(kw, (fan_in, fan_out), jnp.float32, -bound, bound)
    b = jax.random.uniform(kb, (1, fan_out), jnp.float32, -bound, bound)
    return w, b


def init_vae_m2_params(key, input_size, hidden_enc, hidden_dec, latent_dim,
                       num_classes):
    keys = iter(jax.random.split(key, 64))
    enc = {"hidden": []}
    d = input_size + num_classes
    for h in hidden_enc:
        enc["hidden"].append(_init_linear(next(keys), d, h))
        d = h
    enc["w_mu"], enc["b_mu"] = _init_linear(next(keys), d, latent_dim)
    enc["w_lv"], enc["b_lv"] = _init_linear(next(keys), d, latent_dim)

    dec = {"hidden": []}
    d = latent_dim + num_classes
    for h in hidden_dec:
        dec["hidden"].append(_init_linear(next(keys), d, h))
        d = h
    dec["w_out"], dec["b_out"] = _init_linear(next(keys), d, input_size)
    return {"encoder": enc, "decoder": dec}


# --------------------------------------------------------------------------
# One-time packing
# --------------------------------------------------------------------------
def _round_up(n, m):
    return ((n + m - 1) // m) * m


def _pad_to(a, shape):
    if tuple(a.shape) == tuple(shape):
        return a
    return jnp.pad(a, [(0, s - d) for d, s in zip(a.shape, shape)])


def pack_vae_m2_params(params, input_size, num_classes, latent_dim,
                       param_dtype=jnp.bfloat16, act_dtype=None):
    """Pack weights for the fused kernel.

    * hidden widths padded to lane multiples (128) -> full MXU tiles; those
      activations never touch HBM so the padding costs no bandwidth.
    * first-layer K and head/output N dims only rounded to a sublane multiple
      of 8, so the x|y / eps / mu / logvar / out HBM streams stay near true width.
    * weights default to bf16 (full-rate MXU, half the VMEM residency);
      biases stay f32 (added to the f32 accumulator).
    """
    enc, dec = params["encoder"], params["decoder"]
    assert len(enc["hidden"]) >= 1 and len(dec["hidden"]) >= 1
    if act_dtype is None:
        act_dtype = param_dtype        # pass jnp.float32 on v5e (no bf16 VALU)

    r8 = lambda n: _round_up(n, 8)
    r128 = lambda n: _round_up(n, 128)
    K0e = r8(input_size + num_classes)
    C8, L8, Dout8 = r8(num_classes), r8(latent_dim), r8(input_size)

    def padw(w, rp, cp):
        return _pad_to(w, (rp, cp)).astype(param_dtype)

    def padb(b, cp):                   # biases stay f32 (added post-MXU)
        return _pad_to(b, (1, cp)).astype(jnp.float32)

    weights = []

    # Encoder: first layer consumes concat(x, y) directly -> one fused K pass.
    w0, b0 = enc["hidden"][0]
    hp = r128(w0.shape[1])
    weights += [padw(w0, K0e, hp), padb(b0, hp)]
    prev = hp
    for w, b in enc["hidden"][1:]:
        hp = r128(w.shape[1])
        weights += [padw(w, prev, hp), padb(b, hp)]
        prev = hp
    weights += [padw(enc["w_mu"], prev, L8), padb(enc["b_mu"], L8),
                padw(enc["w_lv"], prev, L8), padb(enc["b_lv"], L8)]

    # Decoder: first layer split along fan-in (z rows | y rows).
    w0, b0 = dec["hidden"][0]
    gp = r128(w0.shape[1])
    weights += [padw(w0[:latent_dim], L8, gp),
                padw(w0[latent_dim:], C8, gp),
                padb(b0, gp)]
    prev = gp
    for w, b in dec["hidden"][1:]:
        gp = r128(w.shape[1])
        weights += [padw(w, prev, gp), padb(b, gp)]
        prev = gp
    weights += [padw(dec["w_out"], prev, Dout8), padb(dec["b_out"], Dout8)]

    return {
        "weights": weights,
        "act_dtype": act_dtype,
        "n_enc_hidden": len(enc["hidden"]),
        "n_dec_hidden": len(dec["hidden"]),
        "input_size": input_size,
        "num_classes": num_classes,
        "latent_dim": latent_dim,
        "K0e": K0e, "C8": C8, "L8": L8, "Dout8": Dout8,
    }


# --------------------------------------------------------------------------
# Forward wrapper: padding / slicing glue + single pallas_call
# --------------------------------------------------------------------------
def vae_m2_forward(packed, x, y, eps, output_activation="sigmoid"):
    B = x.shape[0]
    K0e, C8, L8, Dout8 = (packed["K0e"], packed["C8"],
                          packed["L8"], packed["Dout8"])
    weights = packed["weights"]

    try:
        vmem_cap = int(getattr(pltpu.get_tpu_info(), "vmem_capacity_bytes",
                               64 << 20))
    except Exception:  # interpret mode / unknown device
        vmem_cap = 64 << 20

    # Batch tile: big enough for MXU M-utilisation, small enough to fit the
    # generation's VMEM (512 on 128 MiB v5e/v6e, 256 on 64 MiB v7x), and >=2
    # grid steps for larger batches so "parallel" spans both v7x TensorCores.
    tb_cap = 512 if vmem_cap >= (96 << 20) else 256
    if B >= 2 * tb_cap:
        TB = tb_cap
    elif B > 256:
        TB = 256
    elif B > 128:
        TB = 128
    else:
        TB = _round_up(max(B, 1), 8)
    B_p = _round_up(B, TB)

    # torch.cat((x, y), dim=1) done once here -> single fused first-layer
    # matmul.  Feature dims only rounded to a sublane multiple of 8: no
    # 128-wide activation padding copies in HBM.
    xy = jnp.concatenate([x.astype(jnp.float32), y.astype(jnp.float32)], axis=1)
    xy = _pad_to(xy, (B_p, K0e))
    yp = _pad_to(y.astype(jnp.float32), (B_p, C8))
    ep = _pad_to(eps.astype(jnp.float32), (B_p, L8))
    # TODO(synk): optionally generate eps in-kernel via pltpu.prng_seed +
    # pltpu.stateful_normal; the explicit-eps path is kept for parity tests.

    def tile_spec(width):
        return pl.BlockSpec((TB, width), lambda i: (i, 0))

    # Weights use a constant index_map -> fetched once and kept VMEM-resident
    # across the batch grid (the block index never changes, so Pallas does not
    # re-issue their DMA per grid step).
    # TODO(synk): for layers whose double-buffered weights exceed ~half of
    # VMEM (v7x: 64 MiB), add a streamed-weights grid axis instead.
    in_specs = ([tile_spec(K0e), tile_spec(C8), tile_spec(L8)]
                + [pl.BlockSpec(w.shape, lambda i: (0, 0)) for w in weights])
    out_specs = (tile_spec(L8), tile_spec(L8), tile_spec(Dout8))
    out_shape = (jax.ShapeDtypeStruct((B_p, L8), jnp.float32),
                 jax.ShapeDtypeStruct((B_p, L8), jnp.float32),
                 jax.ShapeDtypeStruct((B_p, Dout8), jnp.float32))

    # Cost estimate: 2*K*N flops per matmul row; exp + sigmoid transcendentals.
    mm_flops = sum(2 * w.shape[0] * w.shape[1] for w in weights if w.shape[0] > 1)
    param_bytes = int(sum(w.size * w.dtype.itemsize for w in weights))
    io_bytes = int((xy.size + yp.size + ep.size + B_p * (2 * L8 + Dout8)) * 4)
    cost = pl.CostEstimate(flops=int(B_p * mm_flops),
                           transcendentals=int(B_p * (L8 + Dout8)),
                           bytes_accessed=param_bytes + io_bytes)

    # VMEM budget: double-buffered weights + I/O tiles + live activation temps,
    # capped with headroom below the physical capacity of this generation.
    max_w = max(w.shape[1] for w in weights)
    tile_bytes = TB * (K0e + C8 + 3 * L8 + Dout8) * 4
    act_tmp_bytes = 4 * TB * max_w * 4       # a few live f32 intermediates
    need = 2 * param_bytes + 2 * tile_bytes + act_tmp_bytes
    vmem_limit = int(min(max(vmem_cap - (4 << 20), 16 << 20),
                         max(2 * need, 32 << 20)))

    kernel = functools.partial(_vae_m2_kernel, packed["n_enc_hidden"],
                               packed["n_dec_hidden"], output_activation,
                               packed["act_dtype"])

    mu_p, lv_p, out_p = pl.pallas_call(
        kernel,
        out_shape=out_shape,
        grid=(B_p // TB,),
        in_specs=in_specs,
        out_specs=out_specs,
        compiler_params=pltpu.CompilerParams(
            dimension_semantics=("parallel",),
            vmem_limit_bytes=vmem_limit),
        cost_estimate=cost,
    )(xy, yp, ep, *weights)

    ld, ins = packed["latent_dim"], packed["input_size"]
    return out_p[:B, :ins], mu_p[:B, :ld], lv_p[:B, :ld]


# --------------------------------------------------------------------------
# Pure-JAX reference for sanity checking
# --------------------------------------------------------------------------
def _ref_forward(params, x, y, eps):
    h = jnp.concatenate([x, y], axis=1)
    for w, b in params["encoder"]["hidden"]:
        h = jnp.maximum(h @ w + b, 0.0)
    mu = h @ params["encoder"]["w_mu"] + params["encoder"]["b_mu"]
    logvar = h @ params["encoder"]["w_lv"] + params["encoder"]["b_lv"]
    z = mu + jnp.exp(0.5 * logvar) * eps
    h = jnp.concatenate([z, y], axis=1)
    for w, b in params["decoder"]["hidden"]:
        h = jnp.maximum(h @ w + b, 0.0)
    out = jax.nn.sigmoid(h @ params["decoder"]["w_out"]
                         + params["decoder"]["b_out"])
    return out, mu, logvar


# --------------------------------------------------------------------------
if __name__ == "__main__":
    batch = 8
    input_size = 16
    num_classes = 4
    latent_dim = 8
    hidden_enc = [32, 16]
    hidden_dec = [16, 32]

    root = jax.random.PRNGKey(0)
    k_param, k_x, k_y, k_eps = jax.random.split(root, 4)

    params = init_vae_m2_params(k_param, input_size, hidden_enc, hidden_dec,
                                latent_dim, num_classes)

    x = jax.random.normal(k_x, (batch, input_size), jnp.float32)
    labels = jax.random.randint(k_y, (batch,), 0, num_classes)
    y = jax.nn.one_hot(labels, num_classes, dtype=jnp.float32)
    # torch.randn reparameterization noise is passed in explicitly.
    eps = jax.random.normal(k_eps, (batch, latent_dim), jnp.float32)

    out_ref, mu_ref, lv_ref = _ref_forward(params, x, y, eps)

    # ---- f32 weights & activations: tight check against the reference ----
    packed_f32 = pack_vae_m2_params(params, input_size, num_classes, latent_dim,
                                    param_dtype=jnp.float32)
    fwd_f32 = jax.jit(lambda a, b, c: vae_m2_forward(packed_f32, a, b, c))
    out, mu, logvar = fwd_f32(x, y, eps)
    jax.block_until_ready((out, mu, logvar))
    assert out.shape == (batch, input_size)
    assert mu.shape == (batch, latent_dim) and logvar.shape == (batch, latent_dim)
    assert jnp.allclose(out, out_ref, atol=2e-4)
    assert jnp.allclose(mu, mu_ref, atol=2e-4)
    assert jnp.allclose(logvar, lv_ref, atol=2e-4)

    # ---- default path: bf16 weights + bf16 hidden activations ----
    packed_bf16 = pack_vae_m2_params(params, input_size, num_classes, latent_dim)
    fwd_bf16 = jax.jit(lambda a, b, c: vae_m2_forward(packed_bf16, a, b, c))
    out_b, mu_b, lv_b = fwd_bf16(x, y, eps)
    jax.block_until_ready((out_b, mu_b, lv_b))
    assert float(jnp.max(jnp.abs(out_b - out_ref))) < 5e-2
    assert float(jnp.max(jnp.abs(mu_b - mu_ref))) < 1e-1
    assert float(jnp.max(jnp.abs(lv_b - lv_ref))) < 1e-1

    print("KERNEL_OK")
</pallas_src>

<mosaic_0001>
module attributes {stable_mosaic.version = 11 : i64} {
  func.func @_vae_m2_kernel(%arg0: i32, %arg1: memref<8x24xf32, #tpu.memory_space<vmem>>, %arg2: memref<8x8xf32, #tpu.memory_space<vmem>>, %arg3: memref<8x8xf32, #tpu.memory_space<vmem>>, %arg4: memref<24x128xf32, #tpu.memory_space<vmem>>, %arg5: memref<1x128xf32, #tpu.memory_space<vmem>>, %arg6: memref<128x128xf32, #tpu.memory_space<vmem>>, %arg7: memref<1x128xf32, #tpu.memory_space<vmem>>, %arg8: memref<128x8xf32, #tpu.memory_space<vmem>>, %arg9: memref<1x8xf32, #tpu.memory_space<vmem>>, %arg10: memref<128x8xf32, #tpu.memory_space<vmem>>, %arg11: memref<1x8xf32, #tpu.memory_space<vmem>>, %arg12: memref<8x128xf32, #tpu.memory_space<vmem>>, %arg13: memref<8x128xf32, #tpu.memory_space<vmem>>, %arg14: memref<1x128xf32, #tpu.memory_space<vmem>>, %arg15: memref<128x128xf32, #tpu.memory_space<vmem>>, %arg16: memref<1x128xf32, #tpu.memory_space<vmem>>, %arg17: memref<128x16xf32, #tpu.memory_space<vmem>>, %arg18: memref<1x16xf32, #tpu.memory_space<vmem>>, %arg19: memref<8x8xf32, #tpu.memory_space<vmem>>, %arg20: memref<8x8xf32, #tpu.memory_space<vmem>>, %arg21: memref<8x16xf32, #tpu.memory_space<vmem>>) attributes {dimension_semantics = [#tpu.dimension_semantics<parallel>], iteration_bounds = array<i64: 1>, scalar_prefetch = 0 : i64, scratch_operands = 0 : i64, tpu.core_type = #tpu.core_type<tc>, window_params = [{transform_indices = @transform_0, window_bounds = array<i64: 8, 24>}, {transform_indices = @transform_1, window_bounds = array<i64: 8, 8>}, {transform_indices = @transform_2, window_bounds = array<i64: 8, 8>}, {pipeline_mode = #tpu.pipeline_mode<synchronous>, transform_indices = @transform_3, window_bounds = array<i64: 24, 128>}, {pipeline_mode = #tpu.pipeline_mode<synchronous>, transform_indices = @transform_4, window_bounds = array<i64: 1, 128>}, {pipeline_mode = #tpu.pipeline_mode<synchronous>, transform_indices = @transform_5, window_bounds = array<i64: 128, 128>}, {pipeline_mode = #tpu.pipeline_mode<synchronous>, transform_indices = @transform_6, window_bounds = array<i64: 1, 128>}, {pipeline_mode = #tpu.pipeline_mode<synchronous>, transform_indices = @transform_7, window_bounds = array<i64: 128, 8>}, {pipeline_mode = #tpu.pipeline_mode<synchronous>, transform_indices = @transform_8, window_bounds = array<i64: 1, 8>}, {pipeline_mode = #tpu.pipeline_mode<synchronous>, transform_indices = @transform_9, window_bounds = array<i64: 128, 8>}, {pipeline_mode = #tpu.pipeline_mode<synchronous>, transform_indices = @transform_10, window_bounds = array<i64: 1, 8>}, {pipeline_mode = #tpu.pipeline_mode<synchronous>, transform_indices = @transform_11, window_bounds = array<i64: 8, 128>}, {pipeline_mode = #tpu.pipeline_mode<synchronous>, transform_indices = @transform_12, window_bounds = array<i64: 8, 128>}, {pipeline_mode = #tpu.pipeline_mode<synchronous>, transform_indices = @transform_13, window_bounds = array<i64: 1, 128>}, {pipeline_mode = #tpu.pipeline_mode<synchronous>, transform_indices = @transform_14, window_bounds = array<i64: 128, 128>}, {pipeline_mode = #tpu.pipeline_mode<synchronous>, transform_indices = @transform_15, window_bounds = array<i64: 1, 128>}, {pipeline_mode = #tpu.pipeline_mode<synchronous>, transform_indices = @transform_16, window_bounds = array<i64: 128, 16>}, {pipeline_mode = #tpu.pipeline_mode<synchronous>, transform_indices = @transform_17, window_bounds = array<i64: 1, 16>}, {transform_indices = @transform_18, window_bounds = array<i64: 8, 8>}, {transform_indices = @transform_19, window_bounds = array<i64: 8, 8>}, {transform_indices = @transform_20, window_bounds = array<i64: 8, 16>}]} {
    %c0 = arith.constant 0 : index
    %c0_0 = arith.constant 0 : index
    %0 = vector.load %arg1[%c0, %c0_0] : memref<8x24xf32, #tpu.memory_space<vmem>>, vector<8x24xf32>
    %c0_1 = arith.constant 0 : index
    %c0_2 = arith.constant 0 : index
    %1 = vector.load %arg2[%c0_1, %c0_2] : memref<8x8xf32, #tpu.memory_space<vmem>>, vector<8x8xf32>
    %c0_3 = arith.constant 0 : index
    %c0_4 = arith.constant 0 : index
    %2 = vector.load %arg3[%c0_3, %c0_4] : memref<8x8xf32, #tpu.memory_space<vmem>>, vector<8x8xf32>
    %c0_5 = arith.constant 0 : index
    %c0_6 = arith.constant 0 : index
    %3 = vector.load %arg5[%c0_5, %c0_6] : memref<1x128xf32, #tpu.memory_space<vmem>>, vector<1x128xf32>
    %c0_7 = arith.constant 0 : index
    %c0_8 = arith.constant 0 : index
    %4 = vector.load %arg4[%c0_7, %c0_8] : memref<24x128xf32, #tpu.memory_space<vmem>>, vector<24x128xf32>
    %cst = arith.constant dense<0.000000e+00> : vector<8x128xf32>
    %5 = tpu.matmul %0, %4, %cst {dimension_numbers = #tpu.dot_dimension_numbers<[1], [0], [0], [1], [0, 0, 1, 1], [], []>} : vector<8x24xf32>, vector<24x128xf32>, vector<8x128xf32> -> vector<8x128xf32>
    %6 = vector.broadcast %3 : vector<1x128xf32> to vector<8x128xf32>
    %7 = arith.addf %5, %6 : vector<8x128xf32>
    %cst_9 = arith.constant 0.000000e+00 : f32
    %8 = vector.broadcast %cst_9 : f32 to vector<8x128xf32>
    %9 = arith.maximumf %7, %8 : vector<8x128xf32>
    %c0_10 = arith.constant 0 : index
    %c0_11 = arith.constant 0 : index
    %10 = vector.load %arg7[%c0_10, %c0_11] : memref<1x128xf32, #tpu.memory_space<vmem>>, vector<1x128xf32>
    %c0_12 = arith.constant 0 : index
    %c0_13 = arith.constant 0 : index
    %11 = vector.load %arg6[%c0_12, %c0_13] : memref<128x128xf32, #tpu.memory_space<vmem>>, vector<128x128xf32>
    %cst_14 = arith.constant dense<0.000000e+00> : vector<8x128xf32>
    %12 = tpu.matmul %9, %11, %cst_14 {dimension_numbers = #tpu.dot_dimension_numbers<[1], [0], [0], [1], [0, 0, 1, 1], [], []>} : vector<8x128xf32>, vector<128x128xf32>, vector<8x128xf32> -> vector<8x128xf32>
    %13 = vector.broadcast %10 : vector<1x128xf32> to vector<8x128xf32>
    %14 = arith.addf %12, %13 : vector<8x128xf32>
    %cst_15 = arith.constant 0.000000e+00 : f32
    %15 = vector.broadcast %cst_15 : f32 to vector<8x128xf32>
    %16 = arith.maximumf %14, %15 : vector<8x128xf32>
    %c0_16 = arith.constant 0 : index
    %c0_17 = arith.constant 0 : index
    %17 = vector.load %arg9[%c0_16, %c0_17] : memref<1x8xf32, #tpu.memory_space<vmem>>, vector<1x8xf32>
    %c0_18 = arith.constant 0 : index
    %c0_19 = arith.constant 0 : index
    %18 = vector.load %arg11[%c0_18, %c0_19] : memref<1x8xf32, #tpu.memory_space<vmem>>, vector<1x8xf32>
    %c0_20 = arith.constant 0 : index
    %c0_21 = arith.constant 0 : index
    %19 = vector.load %arg8[%c0_20, %c0_21] : memref<128x8xf32, #tpu.memory_space<vmem>>, vector<128x8xf32>
    %cst_22 = arith.constant dense<0.000000e+00> : vector<8x8xf32>
    %20 = tpu.matmul %16, %19, %cst_22 {dimension_numbers = #tpu.dot_dimension_numbers<[1], [0], [0], [1], [0, 0, 1, 1], [], []>} : vector<8x128xf32>, vector<128x8xf32>, vector<8x8xf32> -> vector<8x8xf32>
    %21 = vector.broadcast %17 : vector<1x8xf32> to vector<8x8xf32>
    %22 = arith.addf %20, %21 : vector<8x8xf32>
    %c0_23 = arith.constant 0 : index
    %c0_24 = arith.constant 0 : index
    %23 = vector.load %arg10[%c0_23, %c0_24] : memref<128x8xf32, #tpu.memory_space<vmem>>, vector<128x8xf32>
    %cst_25 = arith.constant dense<0.000000e+00> : vector<8x8xf32>
    %24 = tpu.matmul %16, %23, %cst_25 {dimension_numbers = #tpu.dot_dimension_numbers<[1], [0], [0], [1], [0, 0, 1, 1], [], []>} : vector<8x128xf32>, vector<128x8xf32>, vector<8x8xf32> -> vector<8x8xf32>
    %25 = vector.broadcast %18 : vector<1x8xf32> to vector<8x8xf32>
    %26 = arith.addf %24, %25 : vector<8x8xf32>
    %c0_26 = arith.constant 0 : index
    %c0_27 = arith.constant 0 : index
    %27 = vector.load %arg19[%c0_26, %c0_27] : memref<8x8xf32, #tpu.memory_space<vmem>>, vector<8x8xf32>
    tpu.vector_store %arg19[%c0_26, %c0_27], %22 {strides = array<i32>} : memref<8x8xf32, #tpu.memory_space<vmem>>, vector<8x8xf32>,
    %c0_28 = arith.constant 0 : index
    %c0_29 = arith.constant 0 : index
    %28 = vector.load %arg20[%c0_28, %c0_29] : memref<8x8xf32, #tpu.memory_space<vmem>>, vector<8x8xf32>
    tpu.vector_store %arg20[%c0_28, %c0_29], %26 {strides = array<i32>} : memref<8x8xf32, #tpu.memory_space<vmem>>, vector<8x8xf32>,
    %cst_30 = arith.constant 5.000000e-01 : f32
    %29 = vector.broadcast %cst_30 : f32 to vector<8x8xf32>
    %30 = arith.mulf %29, %26 : vector<8x8xf32>
    %31 = math.exp %30 : vector<8x8xf32>
    %32 = arith.mulf %31, %2 : vector<8x8xf32>
    %33 = arith.addf %22, %32 : vector<8x8xf32>
    %c0_31 = arith.constant 0 : index
    %c0_32 = arith.constant 0 : index
    %34 = vector.load %arg14[%c0_31, %c0_32] : memref<1x128xf32, #tpu.memory_space<vmem>>, vector<1x128xf32>
    %c0_33 = arith.constant 0 : index
    %c0_34 = arith.constant 0 : index
    %35 = vector.load %arg12[%c0_33, %c0_34] : memref<8x128xf32, #tpu.memory_space<vmem>>, vector<8x128xf32>
    %cst_35 = arith.constant dense<0.000000e+00> : vector<8x128xf32>
    %36 = tpu.matmul %33, %35, %cst_35 {dimension_numbers = #tpu.dot_dimension_numbers<[1], [0], [0], [1], [0, 0, 1, 1], [], []>} : vector<8x8xf32>, vector<8x128xf32>, vector<8x128xf32> -> vector<8x128xf32>
    %c0_36 = arith.constant 0 : index
    %c0_37 = arith.constant 0 : index
    %37 = vector.load %arg13[%c0_36, %c0_37] : memref<8x128xf32, #tpu.memory_space<vmem>>, vector<8x128xf32>
    %cst_38 = arith.constant dense<0.000000e+00> : vector<8x128xf32>
    %38 = tpu.matmul %1, %37, %cst_38 {dimension_numbers = #tpu.dot_dimension_numbers<[1], [0], [0], [1], [0, 0, 1, 1], [], []>} : vector<8x8xf32>, vector<8x128xf32>, vector<8x128xf32> -> vector<8x128xf32>
    %39 = arith.addf %36, %38 : vector<8x128xf32>
    %40 = vector.broadcast %34 : vector<1x128xf32> to vector<8x128xf32>
    %41 = arith.addf %39, %40 : vector<8x128xf32>
    %cst_39 = arith.constant 0.000000e+00 : f32
    %42 = vector.broadcast %cst_39 : f32 to vector<8x128xf32>
    %43 = arith.maximumf %41, %42 : vector<8x128xf32>
    %c0_40 = arith.constant 0 : index
    %c0_41 = arith.constant 0 : index
    %44 = vector.load %arg16[%c0_40, %c0_41] : memref<1x128xf32, #tpu.memory_space<vmem>>, vector<1x128xf32>
    %c0_42 = arith.constant 0 : index
    %c0_43 = arith.constant 0 : index
    %45 = vector.load %arg15[%c0_42, %c0_43] : memref<128x128xf32, #tpu.memory_space<vmem>>, vector<128x128xf32>
    %cst_44 = arith.constant dense<0.000000e+00> : vector<8x128xf32>
    %46 = tpu.matmul %43, %45, %cst_44 {dimension_numbers = #tpu.dot_dimension_numbers<[1], [0], [0], [1], [0, 0, 1, 1], [], []>} : vector<8x128xf32>, vector<128x128xf32>, vector<8x128xf32> -> vector<8x128xf32>
    %47 = vector.broadcast %44 : vector<1x128xf32> to vector<8x128xf32>
    %48 = arith.addf %46, %47 : vector<8x128xf32>
    %cst_45 = arith.constant 0.000000e+00 : f32
    %49 = vector.broadcast %cst_45 : f32 to vector<8x128xf32>
    %50 = arith.maximumf %48, %49 : vector<8x128xf32>
    %c0_46 = arith.constant 0 : index
    %c0_47 = arith.constant 0 : index
    %51 = vector.load %arg18[%c0_46, %c0_47] : memref<1x16xf32, #tpu.memory_space<vmem>>, vector<1x16xf32>
    %c0_48 = arith.constant 0 : index
    %c0_49 = arith.constant 0 : index
    %52 = vector.load %arg17[%c0_48, %c0_49] : memref<128x16xf32, #tpu.memory_space<vmem>>, vector<128x16xf32>
    %cst_50 = arith.constant dense<0.000000e+00> : vector<8x16xf32>
    %53 = tpu.matmul %50, %52, %cst_50 {dimension_numbers = #tpu.dot_dimension_numbers<[1], [0], [0], [1], [0, 0, 1, 1], [], []>} : vector<8x128xf32>, vector<128x16xf32>, vector<8x16xf32> -> vector<8x16xf32>
    %54 = vector.broadcast %51 : vector<1x16xf32> to vector<8x16xf32>
    %55 = arith.addf %53, %54 : vector<8x16xf32>
    %56 = arith.negf %55 : vector<8x16xf32>
    %57 = math.exp %56 : vector<8x16xf32>
    %cst_51 = arith.constant 1.000000e+00 : f32
    %58 = vector.broadcast %cst_51 : f32 to vector<8x16xf32>
    %59 = arith.addf %58, %57 : vector<8x16xf32>
    %60 = arith.divf %58, %59 : vector<8x16xf32>
    %c0_52 = arith.constant 0 : index
    %c0_53 = arith.constant 0 : index
    %61 = vector.load %arg21[%c0_52, %c0_53] : memref<8x16xf32, #tpu.memory_space<vmem>>, vector<8x16xf32>
    tpu.vector_store %arg21[%c0_52, %c0_53], %60 {strides = array<i32>} : memref<8x16xf32, #tpu.memory_space<vmem>>, vector<8x16xf32>,
    return
  }
  func.func @transform_0(%arg0: i32) -> (i32, i32) {
    %c0_i32 = arith.constant 0 : i32
    %c0_i32_0 = arith.constant 0 : i32
    return %arg0, %c0_i32 : i32, i32
  }
  func.func @transform_1(%arg0: i32) -> (i32, i32) {
    %c0_i32 = arith.constant 0 : i32
    %c0_i32_0 = arith.constant 0 : i32
    return %arg0, %c0_i32 : i32, i32
  }
  func.func @transform_2(%arg0: i32) -> (i32, i32) {
    %c0_i32 = arith.constant 0 : i32
    %c0_i32_0 = arith.constant 0 : i32
    return %arg0, %c0_i32 : i32, i32
  }
  func.func @transform_3(%arg0: i32) -> (i32, i32) {
    %c0_i32 = arith.constant 0 : i32
    %c0_i32_0 = arith.constant 0 : i32
    %c0_i32_1 = arith.constant 0 : i32
    return %c0_i32, %c0_i32_0 : i32, i32
  }
  func.func @transform_4(%arg0: i32) -> (i32, i32) {
    %c0_i32 = arith.constant 0 : i32
    %c0_i32_0 = arith.constant 0 : i32
    %c0_i32_1 = arith.constant 0 : i32
    return %c0_i32, %c0_i32_0 : i32, i32
  }
  func.func @transform_5(%arg0: i32) -> (i32, i32) {
    %c0_i32 = arith.constant 0 : i32
    %c0_i32_0 = arith.constant 0 : i32
    %c0_i32_1 = arith.constant 0 : i32
    return %c0_i32, %c0_i32_0 : i32, i32
  }
  func.func @transform_6(%arg0: i32) -> (i32, i32) {
    %c0_i32 = arith.constant 0 : i32
    %c0_i32_0 = arith.constant 0 : i32
    %c0_i32_1 = arith.constant 0 : i32
    return %c0_i32, %c0_i32_0 : i32, i32
  }
  func.func @transform_7(%arg0: i32) -> (i32, i32) {
    %c0_i32 = arith.constant 0 : i32
    %c0_i32_0 = arith.constant 0 : i32
    %c0_i32_1 = arith.constant 0 : i32
    return %c0_i32, %c0_i32_0 : i32, i32
  }
  func.func @transform_8(%arg0: i32) -> (i32, i32) {
    %c0_i32 = arith.constant 0 : i32
    %c0_i32_0 = arith.constant 0 : i32
    %c0_i32_1 = arith.constant 0 : i32
    return %c0_i32, %c0_i32_0 : i32, i32
  }
  func.func @transform_9(%arg0: i32) -> (i32, i32) {
    %c0_i32 = arith.constant 0 : i32
    %c0_i32_0 = arith.constant 0 : i32
    %c0_i32_1 = arith.constant 0 : i32
    return %c0_i32, %c0_i32_0 : i32, i32
  }
  func.func @transform_10(%arg0: i32) -> (i32, i32) {
    %c0_i32 = arith.constant 0 : i32
    %c0_i32_0 = arith.constant 0 : i32
    %c0_i32_1 = arith.constant 0 : i32
    return %c0_i32, %c0_i32_0 : i32, i32
  }
  func.func @transform_11(%arg0: i32) -> (i32, i32) {
    %c0_i32 = arith.constant 0 : i32
    %c0_i32_0 = arith.constant 0 : i32
    %c0_i32_1 = arith.constant 0 : i32
    return %c0_i32, %c0_i32_0 : i32, i32
  }
  func.func @transform_12(%arg0: i32) -> (i32, i32) {
    %c0_i32 = arith.constant 0 : i32
    %c0_i32_0 = arith.constant 0 : i32
    %c0_i32_1 = arith.constant 0 : i32
    return %c0_i32, %c0_i32_0 : i32, i32
  }
  func.func @transform_13(%arg0: i32) -> (i32, i32) {
    %c0_i32 = arith.constant 0 : i32
    %c0_i32_0 = arith.constant 0 : i32
    %c0_i32_1 = arith.constant 0 : i32
    return %c0_i32, %c0_i32_0 : i32, i32
  }
  func.func @transform_14(%arg0: i32) -> (i32, i32) {
    %c0_i32 = arith.constant 0 : i32
    %c0_i32_0 = arith.constant 0 : i32
    %c0_i32_1 = arith.constant 0 : i32
    return %c0_i32, %c0_i32_0 : i32, i32
  }
  func.func @transform_15(%arg0: i32) -> (i32, i32) {
    %c0_i32 = arith.constant 0 : i32
    %c0_i32_0 = arith.constant 0 : i32
    %c0_i32_1 = arith.constant 0 : i32
    return %c0_i32, %c0_i32_0 : i32, i32
  }
  func.func @transform_16(%arg0: i32) -> (i32, i32) {
    %c0_i32 = arith.constant 0 : i32
    %c0_i32_0 = arith.constant 0 : i32
    %c0_i32_1 = arith.constant 0 : i32
    return %c0_i32, %c0_i32_0 : i32, i32
  }
  func.func @transform_17(%arg0: i32) -> (i32, i32) {
    %c0_i32 = arith.constant 0 : i32
    %c0_i32_0 = arith.constant 0 : i32
    %c0_i32_1 = arith.constant 0 : i32
    return %c0_i32, %c0_i32_0 : i32, i32
  }
  func.func @transform_18(%arg0: i32) -> (i32, i32) {
    %c0_i32 = arith.constant 0 : i32
    %c0_i32_0 = arith.constant 0 : i32
    return %arg0, %c0_i32 : i32, i32
  }
  func.func @transform_19(%arg0: i32) -> (i32, i32) {
    %c0_i32 = arith.constant 0 : i32
    %c0_i32_0 = arith.constant 0 : i32
    return %arg0, %c0_i32 : i32, i32
  }
  func.func @transform_20(%arg0: i32) -> (i32, i32) {
    %c0_i32 = arith.constant 0 : i32
    %c0_i32_0 = arith.constant 0 : i32
    return %arg0, %c0_i32 : i32, i32
  }
}

</mosaic_0001>

<bundles_post_ra>
// kernel: _lambda_.1
= control target key start
LH: loop header
LB: loop body
LE: loop exit
PB: predicated region body
PF: predicated region fallthrough
CT: control target
= control target key end

     0   :  { %s1696_s0 = inlined_call_operand.vmem [shape: f32[8,24], index: 0, kind: input, shape index: {}]   ;;  %s1697_s1 = inlined_call_operand.vmem [shape: f32[8,8], index: 1, kind: input, shape index: {}]   ;;  %s1698_s2 = inlined_call_operand.vmem [shape: f32[8,8], index: 2, kind: input, shape index: {}]   ;;  %s1699_s3 = inlined_call_operand.vmem [shape: f32[24,128], index: 3, kind: input, shape index: {}]   ;;  %s1700_s4 = inlined_call_operand.vmem [shape: f32[1,128], index: 4, kind: input, shape index: {}]   ;;  %s1701_s5 = inlined_call_operand.hbm [shape: f32[128,128], index: 5, kind: input, shape index: {}]   ;;  %s1702_s6 = inlined_call_operand.vmem [shape: f32[1,128], index: 6, kind: input, shape index: {}]   ;;  %s1703_s7 = inlined_call_operand.hbm [shape: f32[128,8], index: 7, kind: input, shape index: {}]   ;;  %s1704_s8 = inlined_call_operand.vmem [shape: f32[1,8], index: 8, kind: input, shape index: {}]   ;;  %s1705_s9 = inlined_call_operand.hbm [shape: f32[128,8], index: 9, kind: input, shape index: {}]   ;;  %s1706_s10 = inlined_call_operand.vmem [shape: f32[1,8], index: 10, kind: input, shape index: {}]   ;;  %s1707_s11 = inlined_call_operand.vmem [shape: f32[8,128], index: 11, kind: input, shape index: {}]   ;;  %s1708_s12 = inlined_call_operand.vmem [shape: f32[8,128], index: 12, kind: input, shape index: {}]   ;;  %s1709_s13 = inlined_call_operand.vmem [shape: f32[1,128], index: 13, kind: input, shape index: {}]   ;;  %s1710_s14 = inlined_call_operand.hbm [shape: f32[128,128], index: 14, kind: input, shape index: {}]   ;;  %s1711_s15 = inlined_call_operand.vmem [shape: f32[1,128], index: 15, kind: input, shape index: {}]   ;;  %s1712_s16 = inlined_call_operand.hbm [shape: f32[128,16], index: 16, kind: input, shape index: {}]   ;;  %s1713_s17 = inlined_call_operand.vmem [shape: f32[1,16], index: 17, kind: input, shape index: {}]   ;;  %s1714_s18 = inlined_call_operand.hbm [shape: f32[8,8], index: 18, kind: output, shape index: {0}]   ;;  %s1715_s19 = inlined_call_operand.hbm [shape: f32[8,8], index: 19, kind: output, shape index: {1}]   ;;  %s1716_s20 = inlined_call_operand.hbm [shape: f32[8,16], index: 20, kind: output, shape index: {2}]  }
   0x1   :  { %1718 = sst [smem:[#allocation20_spill]] %s1696_s0 }
   0x2   :  { %1719 = sst [smem:[#allocation21_spill]] %s1697_s1 }
   0x3   :  { %1720 = sst [smem:[#allocation22_spill]] %s1698_s2 }
   0x4   :  { %1721 = sst [smem:[#allocation23_spill]] %s1699_s3 }
   0x5   :  { %1722 = sst [smem:[#allocation24_spill]] %s1700_s4 }
   0x6   :  { %26 = vsyncpa [#allocation3], 0 }
   0x7   :  { %27 = vsyncpa [#allocation6], 0 }
   0x8   :  { %28 = vsyncpa [#allocation9], 0 }
   0x9   :  { %29 = vsyncpa [#allocation4], 0 }
   0xa   :  { %30 = vsyncpa [#allocation13], 0  ;;  %s1390_s1 = smov [#allocation5]   ;;  %s1391_s23 = smov [#allocation8]  }
   0xb   :  { %s60_s22 = sshll.u32 %s1390_s1, 4  ;;  %s94_s24 = sshll.u32 %s1391_s23, 4  ;;  %s61_s22 = int_to_ptr.vmem [resolvable:$true] %s60_s22  ;;  %s95_s24 = int_to_ptr.vmem [resolvable:$true] %s94_s24 }
   0xc   :  { %s1228_s2 = scalar_lea.vmem %s61_s22, 2048  ;;  %p1233_p1 = scmp.lt.s32.totalorder %s61_s22, %s61_s22 }
   0xd   :  { %p1229_p0 = scmp.ne.s32.totalorder %s61_s22, %s1228_s2  ;;  %p1234_p2 = scmp.lt.s32.totalorder %s1228_s2, %s1228_s2 }
   0xf   :  { %p1235_p3 = por %p1234_p2, %p1233_p1 }
  0x11   :  { %p1236_p4 = pnand %p1235_p3, %p1229_p0 }
  0x13   :  { %1239 = shalt.err (!%p1236_p4)
}
  0x14   :  { %s1392_s25 = smov 128   ;;  %s1393_s3 = smov 8  }
  0x15   :  { %66 = dma.hbm_to_vmem [thread:$0]  %s1703_s7, 2048, %s61_s22, [#allocation6], %s1392_s25, %s1392_s25, %s1393_s3  }
  0x16   :  { %s1248_s28 = scalar_lea.vmem %s95_s24, 2048  ;;  %p1253_p6 = scmp.lt.s32.totalorder %s95_s24, %s95_s24 }
  0x17   :  { %p1249_p5 = scmp.ne.s32.totalorder %s95_s24, %s1248_s28  ;;  %p1254_p7 = scmp.lt.s32.totalorder %s1248_s28, %s1248_s28 }
  0x19   :  { %p1255_p8 = por %p1254_p7, %p1253_p6 }
  0x1b   :  { %p1256_p9 = pnand %p1255_p8, %p1249_p5 }
  0x1d   :  { %1259 = shalt.err (!%p1256_p9)
}
  0x1e   :  { %100 = dma.hbm_to_vmem [thread:$0]  %s1710_s14, 2048, %s95_s24, [#allocation9], %s1392_s25, %s1392_s25, %s1393_s3  }
  0x1f   :  { %s1394_s30 = smov [#allocation2]   ;;  %s1395_s21 = smov [#allocation7]  }
  0x20   :  { %s46_s0 = sshll.u32 %s1394_s30, 4  ;;  %s74_s1 = sshll.u32 %s1395_s21, 4  ;;  %s47_s0 = int_to_ptr.vmem [resolvable:$true] %s46_s0  ;;  %s75_s1 = int_to_ptr.vmem [resolvable:$true] %s74_s1 }
  0x21   :  { %s1268_s7 = scalar_lea.vmem %s47_s0, 2048  ;;  %p1273_p11 = scmp.lt.s32.totalorder %s47_s0, %s47_s0 }
  0x22   :  { %p1269_p10 = scmp.ne.s32.totalorder %s47_s0, %s1268_s7  ;;  %p1274_p12 = scmp.lt.s32.totalorder %s1268_s7, %s1268_s7 }
  0x24   :  { %p1275_p13 = por %p1274_p12, %p1273_p11 }
  0x26   :  { %p1276_p0 = pnand %p1275_p13, %p1269_p10 }
  0x28   :  { %1279 = shalt.err (!%p1276_p0)
}
  0x29   :  { %52 = dma.hbm_to_vmem [thread:$0]  %s1701_s5, 2048, %s47_s0, [#allocation3], %s1392_s25, %s1392_s25, %s1393_s3  }
  0x2a   :  { %s1288_s14 = scalar_lea.vmem %s75_s1, 2048  ;;  %p1293_p2 = scmp.lt.s32.totalorder %s75_s1, %s75_s1 }
  0x2b   :  { %p1289_p1 = scmp.ne.s32.totalorder %s75_s1, %s1288_s14  ;;  %p1294_p3 = scmp.lt.s32.totalorder %s1288_s14, %s1288_s14 }
  0x2d   :  { %p1295_p4 = por %p1294_p3, %p1293_p2 }
  0x2f   :  { %p1296_p5 = pnand %p1295_p4, %p1289_p1 }
  0x31   :  { %1299 = shalt.err (!%p1296_p5)
}
  0x32   :  { %80 = dma.hbm_to_vmem [thread:$0]  %s1705_s9, 2048, %s75_s1, [#allocation6], %s1392_s25, %s1392_s25, %s1393_s3  }
  0x33   :  { %s1396_s26 = smov [#allocation10]  }
  0x34   :  { %s108_s27 = sshll.u32 %s1396_s26, 4  ;;  %s109_s27 = int_to_ptr.vmem [resolvable:$true] %s108_s27 }
  0x35   :  { %s1308_s28 = scalar_lea.vmem %s109_s27, 2048  ;;  %p1313_p7 = scmp.lt.s32.totalorder %s109_s27, %s109_s27 }
  0x36   :  { %p1309_p6 = scmp.ne.s32.totalorder %s109_s27, %s1308_s28  ;;  %p1314_p8 = scmp.lt.s32.totalorder %s1308_s28, %s1308_s28 }
  0x38   :  { %p1315_p9 = por %p1314_p8, %p1313_p7 }
  0x3a   :  { %p1316_p10 = pnand %p1315_p9, %p1309_p6 }
  0x3c   :  { %1319 = shalt.err (!%p1316_p10)
}
  0x3d   :  { %114 = dma.hbm_to_vmem [thread:$0]  %s1712_s16, 2048, %s109_s27, [#allocation9], %s1392_s25, %s1392_s25, %s1393_s3  }
  0x3e   :  { %1380 = dma.done.wait [#allocation3], 2048  }
  0x3f   :  { %1381 = vsyncadd [#allocation3], 4294965248 }
  0x40   :  { %1382 = dma.done.wait [#allocation6], 4096  }
  0x41   :  { %1383 = vsyncadd [#allocation6], 4294963200 }
  0x42   :  { %1384 = dma.done.wait [#allocation9], 4096  }
  0x43   :  { %1385 = vsyncadd [#allocation9], 4294963200  ;;  %v1397_v0 = vmov 0.0   ;;  %vm1398_vm0 = vmmov 0   ;;  %s1723_s25 = sld [smem:[#allocation23_spill]]  ;;  %v236_v3 = vld [vmem:[#allocation2 + $0x78] sm:$0xff] }
  0x44   :  { %1008 = vmatprep.subr.mxu0 %v1397_v0  ;;  %1014 = vmatprep.mubr.msk.f32.mxu0 %vm1398_vm0, %v1397_v0  ;;  %v235_v4 = vld [vmem:[#allocation2 + $0x70] sm:$0xff]  ;;  %s1724_s7 = sld [smem:[#allocation20_spill]]  ;;  %vm145_vm1 = vcmask 195584   ;;  %v234_v7 = vld [vmem:[#allocation2 + $0x68] sm:$0xff]  ;;  %v233_v8 = vld [vmem:[#allocation2 + $0x60] sm:$0xff]  ;;  %vm500_vm2 = vcmask 64512  }
  0x45   :  { %1017 = vmatprep.subr.mxu1 %v1397_v0  ;;  %1049 = vmatprep.mubr.msk.f32.mxu1 %vm1398_vm0, %v1397_v0  ;;  %v232_v9 = vld [vmem:[#allocation2 + $0x58] sm:$0xff]  ;;  %v231_v10 = vld [vmem:[#allocation2 + $0x50] sm:$0xff]  ;;  %v230_v11 = vld [vmem:[#allocation2 + $0x48] sm:$0xff]  ;;  %s1725_s14 = sld [smem:[#allocation24_spill]] }
  0x46   :  { %1018 = vmatpush3.msra.mxu1 %v236_v3  ;;  %v229_v12 = vld [vmem:[#allocation2 + $0x40] sm:$0xff]  ;;  %v228_v13 = vld [vmem:[#allocation2 + $0x38] sm:$0xff]  ;;  %v227_v14 = vld [vmem:[#allocation2 + $0x30] sm:$0xff]  ;;  %s1726_s4 = sld [smem:[#allocation21_spill]] }
  0x47   :  { %1019 = vmatprep.subr.mxu1 %v1397_v0  ;;  %v226_v15 = vld [vmem:[#allocation2 + $0x28] sm:$0xff]  ;;  %v225_v16 = vld [vmem:[#allocation2 + $0x20] sm:$0xff]  ;;  %v224_v17 = vld [vmem:[#allocation2 + $0x18] sm:$0xff] }
  0x48   :  { %1020 = vmatpush3.msra.mxu1 %v235_v4  ;;  %v223_v18 = vld [vmem:[#allocation2 + $0x10] sm:$0xff]  ;;  %v222_v19 = vld [vmem:[#allocation2 + $0x8] sm:$0xff]  ;;  %v221_v20 = vld [vmem:[#allocation2] sm:$0xff] }
  0x49   :  { %v138_v1 = vld [vmem:[%s1723_s25 + $0x10] sm:$0xff]  ;;  %v137_v2 = vld [vmem:[%s1723_s25 + $0x8] sm:$0xff]  ;;  %v136_v5 = vld [vmem:[%s1723_s25] sm:$0xff]  ;;  %1021 = vmatprep.subr.mxu1 %v1397_v0 }
  0x4a   :  { %1009 = vmatpush3.msra.mxu0 %v138_v1  ;;  %v132_v6 = vld [vmem:[%s1724_s7] sm:$0xff]  ;;  %1022 = vmatpush3.msra.mxu1 %v234_v7  ;;  %v331_v21 = vld [vmem:[#allocation5 + $0x78] sm:$0xff]  ;;  %v330_v22 = vld [vmem:[#allocation5 + $0x70] sm:$0xff]  ;;  %s1400_s7 = smov [#allocation11]  }
  0x4b   :  { %1010 = vmatprep.subr.mxu0 %v1397_v0  ;;  %1023 = vmatprep.subr.mxu1 %v1397_v0  ;;  %v329_v23 = vld [vmem:[#allocation5 + $0x68] sm:$0xff]  ;;  %v328_v24 = vld [vmem:[#allocation5 + $0x60] sm:$0xff]  ;;  %v327_v25 = vld [vmem:[#allocation5 + $0x58] sm:$0xff]  ;;  %s866_s22 = sshll.u32 %s1400_s7, 4  ;;  %s867_s22 = int_to_ptr.vmem [resolvable:$true] %s866_s22 }
  0x4c   :  { %1011 = vmatpush3.msra.mxu0 %v137_v2  ;;  %1024 = vmatpush3.msra.mxu1 %v233_v8  ;;  %v326_v26 = vld [vmem:[#allocation5 + $0x50] sm:$0xff]  ;;  %v325_v27 = vld [vmem:[#allocation5 + $0x48] sm:$0xff]  ;;  %v324_v28 = vld [vmem:[#allocation5 + $0x40] sm:$0xff] }
  0x4d   :  { %1012 = vmatprep.subr.mxu0 %v1397_v0  ;;  %1025 = vmatprep.subr.mxu1 %v1397_v0  ;;  %v323_v29 = vld [vmem:[#allocation5 + $0x38] sm:$0xff]  ;;  %v322_v30 = vld [vmem:[#allocation5 + $0x30] sm:$0xff]  ;;  %v321_v31 = vld [vmem:[#allocation5 + $0x28] sm:$0xff] }
  0x4e   :  { %1013 = vmatpush3.msra.mxu0 %v136_v5  ;;  %1026 = vmatpush3.msra.mxu1 %v232_v9  ;;  %v320_v32 = vld [vmem:[#allocation5 + $0x20] sm:$0xff]  ;;  %v319_v33 = vld [vmem:[#allocation5 + $0x18] sm:$0xff]  ;;  %v422_v40 = vld [vmem:[#allocation7 + $0x70] sm:$0xff] }
  0x4f   :  { %1015 = vmatmul.mubr.msk.f32.vlgmr.msra.gmra.mxu0 %vm145_vm1, %v132_v6  ;;  %1052 = vmatprep.subr.mxu0 %v1397_v0  ;;  %v904_v34 = vld [vmem:[%s1725_s14] ss:$0 sm:$0xff]  ;;  %v423_v39 = vld [vmem:[#allocation7 + $0x78] sm:$0xff]  ;;  %v421_v41 = vld [vmem:[#allocation7 + $0x68] sm:$0xff] }
  0x50   :  { %1084 = vmatprep.mubr.msk.f32.mxu0 %vm1398_vm0, %v1397_v0  ;;  %1027 = vmatprep.subr.mxu1 %v1397_v0  ;;  %v420_v42 = vld [vmem:[#allocation7 + $0x60] sm:$0xff]  ;;  %v419_v43 = vld [vmem:[#allocation7 + $0x58] sm:$0xff]  ;;  %v418_v44 = vld [vmem:[#allocation7 + $0x50] sm:$0xff] }
  0x51   :  { %1028 = vmatpush3.msra.mxu1 %v231_v10  ;;  %1053 = vmatpush3.msra.mxu0 %v331_v21  ;;  %v417_v45 = vld [vmem:[#allocation7 + $0x48] sm:$0xff]  ;;  %v416_v46 = vld [vmem:[#allocation7 + $0x40] sm:$0xff]  ;;  %v415_v47 = vld [vmem:[#allocation7 + $0x38] sm:$0xff] }
  0x52   :  { %1029 = vmatprep.subr.mxu1 %v1397_v0  ;;  %1054 = vmatprep.subr.mxu0 %v1397_v0  ;;  %v414_v48 = vld [vmem:[#allocation7 + $0x30] sm:$0xff]  ;;  %v413_v49 = vld [vmem:[#allocation7 + $0x28] sm:$0xff]  ;;  %v412_v50 = vld [vmem:[#allocation7 + $0x20] sm:$0xff] }
  0x53   :  { %1030 = vmatpush3.msra.mxu1 %v230_v11  ;;  %1055 = vmatpush3.msra.mxu0 %v330_v22  ;;  %v411_v51 = vld [vmem:[#allocation7 + $0x18] sm:$0xff]  ;;  %v318_v52 = vld [vmem:[#allocation5 + $0x10] sm:$0xff]  ;;  %v317_v54 = vld [vmem:[#allocation5 + $0x8] sm:$0xff] }
  0x54   :  { %1031 = vmatprep.subr.mxu1 %v1397_v0  ;;  %1056 = vmatprep.subr.mxu0 %v1397_v0  ;;  %v410_v53 = vld [vmem:[#allocation7 + $0x10] sm:$0xff]  ;;  %v409_v55 = vld [vmem:[#allocation7 + $0x8] sm:$0xff]  ;;  %v316_v56 = vld [vmem:[#allocation5] sm:$0xff] }
  0x55   :  { %1032 = vmatpush3.msra.mxu1 %v229_v12  ;;  %1057 = vmatpush3.msra.mxu0 %v329_v23  ;;  %v408_v57 = vld [vmem:[#allocation7] sm:$0xff]  ;;  %v677_v21 = vld [vmem:[#allocation8 + $0x58] sm:$0xff]  ;;  %v676_v22 = vld [vmem:[#allocation8 + $0x50] sm:$0xff] }
  0x56   :  { %1033 = vmatprep.subr.mxu1 %v1397_v0  ;;  %1058 = vmatprep.subr.mxu0 %v1397_v0  ;;  %v906_v58 = vld [vmem:[%s1702_s6] ss:$0 sm:$0xff]  ;;  %v675_v23 = vld [vmem:[#allocation8 + $0x48] sm:$0xff] }
  0x57   :  { %1034 = vmatpush3.msra.mxu1 %v228_v13  ;;  %1059 = vmatpush3.msra.mxu0 %v328_v24  ;;  %v510_v63 = vld [vmem:[%s1708_s12] sm:$0xff] }
  0x58   :  { %1035 = vmatprep.subr.mxu1 %v1397_v0  ;;  %1060 = vmatprep.subr.mxu0 %v1397_v0  ;;  %v133_v1 = vld [vmem:[%s1726_s4] sm:$0xff] }
  0x59   :  { %1036 = vmatpush3.msra.mxu1 %v227_v14  ;;  %1061 = vmatpush3.msra.mxu0 %v327_v25  ;;  %v509_v2 = vld [vmem:[%s1707_s11] sm:$0xff]  ;;  %v673_v25 = vld [vmem:[#allocation8 + $0x38] sm:$0xff] }
  0x5a   :  { %1037 = vmatprep.subr.mxu1 %v1397_v0  ;;  %1062 = vmatprep.subr.mxu0 %v1397_v0  ;;  %v907_v3 = vld [vmem:[%s1704_s8] ss:$0 sm:$0xff]  ;;  %s1727_s8 = sld [smem:[#allocation22_spill]] }
  0x5b   :  { %1038 = vmatpush3.msra.mxu1 %v226_v15  ;;  %1063 = vmatpush3.msra.mxu0 %v326_v26  ;;  %v908_v4 = vld [vmem:[%s1706_s10] ss:$0 sm:$0xff]  ;;  %v672_v26 = vld [vmem:[#allocation8 + $0x30] sm:$0xff] }
  0x5c   :  { %1039 = vmatprep.subr.mxu1 %v1397_v0  ;;  %1064 = vmatprep.subr.mxu0 %v1397_v0  ;;  %v674_v24 = vld [vmem:[#allocation8 + $0x40] sm:$0xff] }
  0x5d   :  { %1040 = vmatpush3.msra.mxu1 %v225_v16  ;;  %1065 = vmatpush3.msra.mxu0 %v325_v27  ;;  %v671_v27 = vld [vmem:[#allocation8 + $0x28] sm:$0xff] }
  0x5e   :  { %1041 = vmatprep.subr.mxu1 %v1397_v0  ;;  %1066 = vmatprep.subr.mxu0 %v1397_v0 }
  0x5f   :  { %1042 = vmatpush3.msra.mxu1 %v224_v17  ;;  %1067 = vmatpush3.msra.mxu0 %v324_v28  ;;  %v681_v17 = vld [vmem:[#allocation8 + $0x78] sm:$0xff]  ;;  %v670_v28 = vld [vmem:[#allocation8 + $0x20] sm:$0xff] }
  0x60   :  { %1043 = vmatprep.subr.mxu1 %v1397_v0  ;;  %1068 = vmatprep.subr.mxu0 %v1397_v0  ;;  %v134_v13 = vld [vmem:[%s1727_s8] sm:$0xff] }
  0x61   :  { %1044 = vmatpush3.msra.mxu1 %v223_v18  ;;  %1069 = vmatpush3.msra.mxu0 %v323_v29  ;;  %v680_v18 = vld [vmem:[#allocation8 + $0x70] sm:$0xff] }
  0x62   :  { %1045 = vmatprep.subr.mxu1 %v1397_v0  ;;  %1070 = vmatprep.subr.mxu0 %v1397_v0 }
  0x63   :  { %1046 = vmatpush3.msra.mxu1 %v222_v19  ;;  %1071 = vmatpush3.msra.mxu0 %v322_v30  ;;  %v679_v19 = vld [vmem:[#allocation8 + $0x68] sm:$0xff] }
  0x64   :  { %1047 = vmatprep.subr.mxu1 %v1397_v0  ;;  %1072 = vmatprep.subr.mxu0 %v1397_v0 }
  0x65   :  { %1048 = vmatpush3.msra.mxu1 %v221_v20  ;;  %1073 = vmatpush3.msra.mxu0 %v321_v31  ;;  %v678_v20 = vld [vmem:[#allocation8 + $0x60] sm:$0xff]  ;;  %v669_v31 = vld [vmem:[#allocation8 + $0x18] sm:$0xff] }
  0x66   :  { %1087 = vmatprep.subr.mxu1 %v1397_v0  ;;  %1074 = vmatprep.subr.mxu0 %v1397_v0 }
  0x67   :  { %1075 = vmatpush3.msra.mxu0 %v320_v32  ;;  %v668_v32 = vld [vmem:[#allocation8 + $0x10] sm:$0xff] }
  0x68   :  { %1076 = vmatprep.subr.mxu0 %v1397_v0 }
  0x69   :  { %1077 = vmatpush3.msra.mxu0 %v319_v33  ;;  %v667_v33 = vld [vmem:[#allocation8 + $0x8] sm:$0xff] }
  0x6a   :  { %1078 = vmatprep.subr.mxu0 %v1397_v0 }
  0x6b   :  { %1079 = vmatpush3.msra.mxu0 %v318_v52 }
  0x6c   :  { %1080 = vmatprep.subr.mxu0 %v1397_v0 }
  0x6d   :  { %1081 = vmatpush3.msra.mxu0 %v317_v54  ;;  %v762_v54 = vld [vmem:[#allocation10 + $0x10] sm:$0xff] }
  0x6e   :  { %1082 = vmatprep.subr.mxu0 %v1397_v0 }
  0x6f   :  { %1083 = vmatpush3.msra.mxu0 %v316_v56  ;;  %v760_v56 = vld [vmem:[#allocation10] sm:$0xff] }
  0x70   :  { %1122 = vmatprep.subr.mxu0 %v1397_v0 }
 0x10f   :  { %v215_v35 = vpop.f32.mrf.mxu0 }
 0x110   :  { %v216_v36 = vadd.f32 %v904_v34, %v215_v35  ;;  %v666_v34 = vld [vmem:[#allocation8] sm:$0xff]  ;;  %v775_v35 = vld [vmem:[#allocation10 + $0x78] sm:$0xff] }
 0x111   :  { %v1016_v37 = vpop.f32.mrf.mxu0 }
 0x112   :  { %v219_v38 = vmax.f32 %v216_v36, 0.0  ;;  %v774_v36 = vld [vmem:[#allocation10 + $0x70] sm:$0xff]  ;;  %v773_v37 = vld [vmem:[#allocation10 + $0x68] sm:$0xff] }
 0x114   :  { %1050 = vmatmul.mubr.f32.vlgmr.msra.gmra.mxu1 %v219_v38  ;;  %v772_v38 = vld [vmem:[#allocation10 + $0x60] sm:$0xff] }
 0x115   :  { %1088 = vmatpush3.msra.mxu1 %v423_v39  ;;  %1119 = vmatprep.mubr.msk.f32.mxu1 %vm1398_vm0, %v1397_v0  ;;  %v771_v39 = vld [vmem:[#allocation10 + $0x58] sm:$0xff] }
 0x116   :  { %1089 = vmatprep.subr.mxu1 %v1397_v0 }
 0x117   :  { %1090 = vmatpush3.msra.mxu1 %v422_v40  ;;  %v770_v40 = vld [vmem:[#allocation10 + $0x50] sm:$0xff] }
 0x118   :  { %1091 = vmatprep.subr.mxu1 %v1397_v0 }
 0x119   :  { %1092 = vmatpush3.msra.mxu1 %v421_v41  ;;  %v769_v41 = vld [vmem:[#allocation10 + $0x48] sm:$0xff] }
 0x11a   :  { %1093 = vmatprep.subr.mxu1 %v1397_v0 }
 0x11b   :  { %1094 = vmatpush3.msra.mxu1 %v420_v42  ;;  %v768_v42 = vld [vmem:[#allocation10 + $0x40] sm:$0xff] }
 0x11c   :  { %1095 = vmatprep.subr.mxu1 %v1397_v0 }
 0x11d   :  { %1096 = vmatpush3.msra.mxu1 %v419_v43  ;;  %v767_v43 = vld [vmem:[#allocation10 + $0x38] sm:$0xff] }
 0x11e   :  { %1097 = vmatprep.subr.mxu1 %v1397_v0 }
 0x11f   :  { %1098 = vmatpush3.msra.mxu1 %v418_v44  ;;  %v766_v44 = vld [vmem:[#allocation10 + $0x30] sm:$0xff] }
 0x120   :  { %1099 = vmatprep.subr.mxu1 %v1397_v0 }
 0x121   :  { %1100 = vmatpush3.msra.mxu1 %v417_v45  ;;  %v765_v45 = vld [vmem:[#allocation10 + $0x28] sm:$0xff] }
 0x122   :  { %1101 = vmatprep.subr.mxu1 %v1397_v0 }
 0x123   :  { %1102 = vmatpush3.msra.mxu1 %v416_v46  ;;  %v764_v46 = vld [vmem:[#allocation10 + $0x20] sm:$0xff] }
 0x124   :  { %1103 = vmatprep.subr.mxu1 %v1397_v0 }
 0x125   :  { %1104 = vmatpush3.msra.mxu1 %v415_v47  ;;  %v763_v47 = vld [vmem:[#allocation10 + $0x18] sm:$0xff] }
 0x126   :  { %1105 = vmatprep.subr.mxu1 %v1397_v0 }
 0x127   :  { %1106 = vmatpush3.msra.mxu1 %v414_v48  ;;  %v911_v48 = vld [vmem:[%s1709_s13] ss:$0 sm:$0xff]  ;;  %s1399_s13 = smov [#allocation12]  }
 0x128   :  { %1107 = vmatprep.subr.mxu1 %v1397_v0  ;;  %s876_s1 = sshll.u32 %s1399_s13, 4  ;;  %s877_s1 = int_to_ptr.vmem [resolvable:$true] %s876_s1 }
 0x129   :  { %1108 = vmatpush3.msra.mxu1 %v413_v49  ;;  %s1320_s23 = scalar_lea.vmem %s877_s1, 128  ;;  %p1325_p12 = scmp.lt.s32.totalorder %s877_s1, %s877_s1 }
 0x12a   :  { %1109 = vmatprep.subr.mxu1 %v1397_v0  ;;  %p1321_p11 = scmp.ne.s32.totalorder %s877_s1, %s1320_s23  ;;  %p1326_p13 = scmp.lt.s32.totalorder %s1320_s23, %s1320_s23 }
 0x12b   :  { %1110 = vmatpush3.msra.mxu1 %v412_v50 }
 0x12c   :  { %1111 = vmatprep.subr.mxu1 %v1397_v0  ;;  %p1327_p0 = por %p1326_p13, %p1325_p12 }
 0x12d   :  { %1112 = vmatpush3.msra.mxu1 %v411_v51 }
 0x12e   :  { %1113 = vmatprep.subr.mxu1 %v1397_v0  ;;  %p1328_p1 = pnand %p1327_p0, %p1321_p11 }
 0x12f   :  { %1114 = vmatpush3.msra.mxu1 %v410_v53 }
 0x130   :  { %1115 = vmatprep.subr.mxu1 %v1397_v0 }
 0x131   :  { %1116 = vmatpush3.msra.mxu1 %v409_v55  ;;  %v761_v55 = vld [vmem:[#allocation10 + $0x8] sm:$0xff] }
 0x132   :  { %1117 = vmatprep.subr.mxu1 %v1397_v0 }
 0x133   :  { %1118 = vmatpush3.msra.mxu1 %v408_v57  ;;  %v912_v57 = vld [vmem:[%s1711_s15] ss:$0 sm:$0xff] }
 0x134   :  { %1167 = vmatprep.subr.mxu1 %v1397_v0 }
 0x1d4   :  { %v309_v59 = vpop.f32.mrf.mxu1 }
 0x1d5   :  { %v310_v60 = vadd.f32 %v906_v58, %v309_v59 }
 0x1d6   :  { %v1051_v61 = vpop.f32.mrf.mxu1 }
 0x1d7   :  { %v313_v62 = vmax.f32 %v310_v60, 0.0 }
 0x1d9   :  { %1085 = vmatmul.mubr.f32.vlgmr.msra.gmra.mxu0 %v313_v62  ;;  %1120 = vmatmul.mubr.f32.vlgmr.msra.gmra.mxu1 %v313_v62 }
 0x1da   :  { %1124 = vmatprep.mubr.msk.f32.mxu0 %vm1398_vm0, %v1397_v0  ;;  %1199 = vmatprep.mubr.msk.f32.mxu1 %vm1398_vm0, %v1397_v0 }
 0x1db   :  { %1123 = vmatpush3.msra.mxu0 %v510_v63  ;;  %1168 = vmatpush3.msra.mxu1 %v775_v35 }
 0x1dc   :  { %1127 = vmatprep.subr.mxu0 %v1397_v0  ;;  %1169 = vmatprep.subr.mxu1 %v1397_v0 }
 0x1dd   :  { %1125 = vmatmul.mubr.msk.f32.vlgmr.msra.gmra.mxu0 %vm500_vm2, %v133_v1  ;;  %1170 = vmatpush3.msra.mxu1 %v774_v36 }
 0x1de   :  { %1128 = vmatpush3.msra.mxu0 %v509_v2  ;;  %1129 = vmatprep.mubr.msk.f32.mxu0 %vm1398_vm0, %v1397_v0 }
 0x1df   :  { %1132 = vmatprep.subr.mxu0 %v1397_v0  ;;  %1171 = vmatprep.subr.mxu1 %v1397_v0 }
 0x1e0   :  { %1172 = vmatpush3.msra.mxu1 %v773_v37 }
 0x1e1   :  { %1173 = vmatprep.subr.mxu1 %v1397_v0 }
 0x1e2   :  { %1174 = vmatpush3.msra.mxu1 %v772_v38 }
 0x1e3   :  { %1175 = vmatprep.subr.mxu1 %v1397_v0 }
 0x1e4   :  { %1176 = vmatpush3.msra.mxu1 %v771_v39 }
 0x1e5   :  { %1177 = vmatprep.subr.mxu1 %v1397_v0 }
 0x1e6   :  { %1178 = vmatpush3.msra.mxu1 %v770_v40 }
 0x1e7   :  { %1179 = vmatprep.subr.mxu1 %v1397_v0 }
 0x1e8   :  { %1180 = vmatpush3.msra.mxu1 %v769_v41 }
 0x1e9   :  { %1181 = vmatprep.subr.mxu1 %v1397_v0 }
 0x1ea   :  { %1182 = vmatpush3.msra.mxu1 %v768_v42 }
 0x1eb   :  { %1183 = vmatprep.subr.mxu1 %v1397_v0 }
 0x1ec   :  { %1184 = vmatpush3.msra.mxu1 %v767_v43 }
 0x1ed   :  { %1185 = vmatprep.subr.mxu1 %v1397_v0 }
 0x1ee   :  { %1186 = vmatpush3.msra.mxu1 %v766_v44 }
 0x1ef   :  { %1187 = vmatprep.subr.mxu1 %v1397_v0 }
 0x1f0   :  { %1188 = vmatpush3.msra.mxu1 %v765_v45 }
 0x1f1   :  { %1189 = vmatprep.subr.mxu1 %v1397_v0 }
 0x1f2   :  { %1190 = vmatpush3.msra.mxu1 %v764_v46 }
 0x1f3   :  { %1191 = vmatprep.subr.mxu1 %v1397_v0 }
 0x1f4   :  { %1192 = vmatpush3.msra.mxu1 %v763_v47 }
 0x1f5   :  { %1193 = vmatprep.subr.mxu1 %v1397_v0 }
 0x1f6   :  { %1194 = vmatpush3.msra.mxu1 %v762_v54 }
 0x1f7   :  { %1195 = vmatprep.subr.mxu1 %v1397_v0 }
 0x1f8   :  { %1196 = vmatpush3.msra.mxu1 %v761_v55 }
 0x1f9   :  { %1197 = vmatprep.subr.mxu1 %v1397_v0 }
 0x1fa   :  { %1198 = vmatpush3.msra.mxu1 %v760_v56 }
 0x299   :  { %v404_v5 = vpop.f32.mrf.mxu0  ;;  %v496_v6 = vpop.f32.mrf.mxu1 }
 0x29a   :  { %v405_v7 = vadd.f32 %v907_v3, %v404_v5  ;;  %v497_v8 = vadd.f32 %v908_v4, %v496_v6 }
 0x29b   :  { %v1086_v9 = vpop.f32.mrf.mxu0  ;;  %v1121_v10 = vpop.f32.mrf.mxu1 }
 0x29c   :  { %v503_v11 = vmul.f32 0.5, %v497_v8  ;;  %501 = vst.msk [vmem:[#allocation11] sm:$0xff] %vm500_vm2, %v405_v7  ;;  %502 = vst.msk [vmem:[#allocation12] sm:$0xff] %vm500_vm2, %v497_v8 }
 0x29d   :  { %v580_v29 = vpop.f32.mrf.mxu0 }
 0x29e   :  { %v504_v12 = vmul.f32 1.442695, %v503_v11 }
 0x29f   :  { %v1126_v30 = vpop.f32.mrf.mxu0 }
 0x2a0   :  { %1214 = vpow2.f32 %v504_v12 }
 0x2ad   :  { %v1215_v14 = vpop.eup %1214 }
 0x2ae   :  { %v506_v15 = vmul.f32 %v1215_v14, %v134_v13 }
 0x2b0   :  { %v507_v16 = vadd.f32 %v506_v15, %v405_v7 }
 0x2b2   :  { %1130 = vmatmul.mubr.msk.f32.vlgmr.msra.gmra.mxu0 %vm500_vm2, %v507_v16 }
 0x2b3   :  { %1133 = vmatpush3.msra.mxu0 %v681_v17  ;;  %1164 = vmatprep.mubr.msk.f32.mxu0 %vm1398_vm0, %v1397_v0 }
 0x2b4   :  { %1134 = vmatprep.subr.mxu0 %v1397_v0 }
 0x2b5   :  { %1135 = vmatpush3.msra.mxu0 %v680_v18 }
 0x2b6   :  { %1136 = vmatprep.subr.mxu0 %v1397_v0 }
 0x2b7   :  { %1137 = vmatpush3.msra.mxu0 %v679_v19 }
 0x2b8   :  { %1138 = vmatprep.subr.mxu0 %v1397_v0 }
 0x2b9   :  { %1139 = vmatpush3.msra.mxu0 %v678_v20 }
 0x2ba   :  { %1140 = vmatprep.subr.mxu0 %v1397_v0 }
 0x2bb   :  { %1141 = vmatpush3.msra.mxu0 %v677_v21 }
 0x2bc   :  { %1142 = vmatprep.subr.mxu0 %v1397_v0 }
 0x2bd   :  { %1143 = vmatpush3.msra.mxu0 %v676_v22 }
 0x2be   :  { %1144 = vmatprep.subr.mxu0 %v1397_v0 }
 0x2bf   :  { %1145 = vmatpush3.msra.mxu0 %v675_v23 }
 0x2c0   :  { %1146 = vmatprep.subr.mxu0 %v1397_v0 }
 0x2c1   :  { %1147 = vmatpush3.msra.mxu0 %v674_v24 }
 0x2c2   :  { %1148 = vmatprep.subr.mxu0 %v1397_v0 }
 0x2c3   :  { %1149 = vmatpush3.msra.mxu0 %v673_v25 }
 0x2c4   :  { %1150 = vmatprep.subr.mxu0 %v1397_v0 }
 0x2c5   :  { %1151 = vmatpush3.msra.mxu0 %v672_v26 }
 0x2c6   :  { %1152 = vmatprep.subr.mxu0 %v1397_v0 }
 0x2c7   :  { %1153 = vmatpush3.msra.mxu0 %v671_v27 }
 0x2c8   :  { %1154 = vmatprep.subr.mxu0 %v1397_v0 }
 0x2c9   :  { %1155 = vmatpush3.msra.mxu0 %v670_v28 }
 0x2ca   :  { %1156 = vmatprep.subr.mxu0 %v1397_v0 }
 0x2cb   :  { %1157 = vmatpush3.msra.mxu0 %v669_v31 }
 0x2cc   :  { %1158 = vmatprep.subr.mxu0 %v1397_v0 }
 0x2cd   :  { %1159 = vmatpush3.msra.mxu0 %v668_v32 }
 0x2ce   :  { %1160 = vmatprep.subr.mxu0 %v1397_v0 }
 0x2cf   :  { %1161 = vmatpush3.msra.mxu0 %v667_v33 }
 0x2d0   :  { %1162 = vmatprep.subr.mxu0 %v1397_v0 }
 0x2d1   :  { %1163 = vmatpush3.msra.mxu0 %v666_v34 }
 0x372   :  { %v653_v49 = vpop.f32.mrf.mxu0 }
 0x373   :  { %v654_v50 = vadd.f32 %v653_v49, %v580_v29 }
 0x374   :  { %v1131_v51 = vpop.f32.mrf.mxu0 }
 0x375   :  { %v663_v52 = vadd.f32 %v911_v48, %v654_v50 }
 0x377   :  { %v664_v53 = vmax.f32 %v663_v52, 0.0 }
 0x379   :  { %1165 = vmatmul.mubr.f32.vlgmr.msra.gmra.mxu0 %v664_v53 }
 0x439   :  { %v754_v58 = vpop.f32.mrf.mxu0 }
 0x43a   :  { %v755_v59 = vadd.f32 %v912_v57, %v754_v58 }
 0x43b   :  { %v1166_v60 = vpop.f32.mrf.mxu0 }
 0x43c   :  { %v758_v61 = vmax.f32 %v755_v59, 0.0 }
 0x43e   :  { %1200 = vmatmul.mubr.f32.vlgmr.msra.gmra.mxu1 %v758_v61 }
 0x43f   :  { %1331 = shalt.err (!%p1328_p1)
}
 0x440   :  { %879 = dma.vmem_to_hbm [thread:$0]  %s877_s1, 128, %s1715_s19, [#allocation13]  }
 0x441   :  { %s1340_s24 = scalar_lea.vmem %s867_s22, 128  ;;  %p1345_p3 = scmp.lt.s32.totalorder %s867_s22, %s867_s22 }
 0x442   :  { %p1341_p2 = scmp.ne.s32.totalorder %s867_s22, %s1340_s24  ;;  %p1346_p4 = scmp.lt.s32.totalorder %s1340_s24, %s1340_s24 }
 0x444   :  { %p1347_p5 = por %p1346_p4, %p1345_p3 }
 0x446   :  { %p1348_p6 = pnand %p1347_p5, %p1341_p2 }
 0x448   :  { %1351 = shalt.err (!%p1348_p6)
}
 0x449   :  { %869 = dma.vmem_to_hbm [thread:$0]  %s867_s22, 128, %s1714_s18, [#allocation4]   ;;  %v913_v0 = vld [vmem:[%s1713_s17] ss:$0 sm:$0xff]  ;;  %vm858_vm3 = vcmask 130048  }
 0x44a   :  { %s1401_s19 = smov [#allocation14]  }
 0x44b   :  { %s886_s5 = sshll.u32 %s1401_s19, 4  ;;  %s887_s5 = int_to_ptr.vmem [resolvable:$true] %s886_s5 }
 0x44c   :  { %s1360_s4 = scalar_lea.vmem %s887_s5, 128  ;;  %p1365_p8 = scmp.lt.s32.totalorder %s887_s5, %s887_s5 }
 0x44d   :  { %p1361_p7 = scmp.ne.s32.totalorder %s887_s5, %s1360_s4  ;;  %p1366_p9 = scmp.lt.s32.totalorder %s1360_s4, %s1360_s4 }
 0x44f   :  { %p1367_p10 = por %p1366_p9, %p1365_p8 }
 0x451   :  { %p1368_p11 = pnand %p1367_p10, %p1361_p7 }
 0x4fe   :  { %v848_v62 = vpop.f32.mrf.mxu1 }
 0x4ff   :  { %v849_v63 = vadd.f32 %v913_v0, %v848_v62 }
 0x500   :  { %v1201_v1 = vpop.f32.mrf.mxu1 }
 0x501   :  { %v914_v2 = vmul.f32 -1.442695, %v849_v63 }
 0x503   :  { %1216 = vpow2.f32 %v914_v2 }
 0x510   :  { %v1217_v3 = vpop.eup %1216 }
 0x511   :  { %v855_v4 = vadd.f32 1.0, %v1217_v3 }
 0x513   :  { %1218 = vrcp.f32 %v855_v4 }
 0x520   :  { %v1219_v5 = vpop.eup %1218 }
 0x521   :  { %859 = vst.msk [vmem:[#allocation14] sm:$0xff] %vm858_vm3, %v1219_v5 }
 0x522   :  { %1371 = shalt.err (!%p1368_p11)
}
 0x523   :  { %889 = dma.vmem_to_hbm [thread:$0]  %s887_s5, 128, %s1716_s20, [#allocation13]  }
 0x524   :  { %1386 = dma.done.wait [#allocation4], 128  }
 0x525   :  { %1387 = vsyncadd [#allocation4], 4294967168 }
 0x526   :  { %1388 = dma.done.wait [#allocation13], 256  }
 0x527   :  { %1389 = vsyncadd [#allocation13], 4294967040 }
 0x528   :  { %899 = vsyncpa [#allocation3], 1 }
 0x529   :  { %900 = vsyncpa [#allocation6], 1 }
 0x52a   :  { %901 = vsyncpa [#allocation9], 1 }
 0x52b   :  { %902 = vsyncpa [#allocation4], 1 }
 0x52c   :  { %903 = vsyncpa [#allocation13], 1 }

</bundles_post_ra>
